<compile_context>
chip_gen: v6e
topology: v6e:2x2x1
jax: 0.10.0
libtpu: 0.0.40
codegen_flags: <defaults>
</compile_context>

<pallas_src>
import jax
import jax.numpy as jnp
from jax.experimental import pallas as pl
from jax.experimental.pallas import tpu as pltpu


def _round_up(v, m):
    return (v + m - 1) // m * m


def _choose_lane_tile(num_channels, hw_padded, itemsize):
    """Largest lane tile (multiple of 128) that divides hw_padded and keeps the
    double-buffered in+out working set small enough for every TPU generation."""
    sublane = 32 // itemsize                        # 8 for f32, 16 for bf16, 32 for i8
    c_padded = _round_up(num_channels, sublane)     # VMEM tile pads C to sublane granularity
    per_lane_bytes = c_padded * itemsize
    budget_bytes = 2 * 1024 * 1024                  # per tile; ~8 MiB total across 4 buffers
    cap = max(128, (budget_bytes // per_lane_bytes) // 128 * 128)
    cap = min(cap, 2048)                            # 512-2048 lanes is the measured sweet spot
    n = hw_padded // 128
    best = 1
    for d in range(1, n + 1):
        if n % d == 0 and d * 128 <= cap:
            best = d
    return best * 128


def _sse_kernel(x_ref, w_ref, b_ref, o_ref):
    # x_ref/o_ref: (C, lane_tile) VMEM tile (batch dim squeezed away by the BlockSpec)
    # w_ref:       (C, 1) VMEM, resident across the grid (constant index_map)
    # b_ref:       (1,)   SMEM scalar bias
    x = x_ref[...]                                    # keep the tile in its input dtype
    w = w_ref[...].astype(jnp.float32)                # (C, 1)

    # 1x1 conv to a single channel == channel-axis weighted reduction (VPU + XLU),
    # accumulated in f32; sigmoid on the EUP; both hidden under the DMA.
    s = jnp.sum(x.astype(jnp.float32) * w, axis=0, keepdims=True) + b_ref[0]   # (1, lanes)
    gate = jax.nn.sigmoid(s).astype(x.dtype)                                   # (1, lanes)

    o_ref[...] = x * gate                             # broadcast over channels, input dtype


def spatial_se_gate(x, conv_weight, conv_bias):
    """x: (B, C, H, W); conv_weight: (1, C, 1, 1); conv_bias: (1,). Returns NCHW."""
    B, C, H, W = x.shape
    HW = H * W
    HW_pad = _round_up(HW, 128)                       # lane-dense last dim -> unmasked stores
    itemsize = jnp.dtype(x.dtype).itemsize

    x_flat = x.reshape(B, C, HW)
    if HW_pad != HW:
        x_flat = jnp.pad(x_flat, ((0, 0), (0, 0), (0, HW_pad - HW)))

    lane_tile = _choose_lane_tile(C, HW_pad, itemsize)
    grid = (B, HW_pad // lane_tile)

    w = conv_weight.reshape(C, 1)                     # weights of the single output channel
    b = conv_bias.reshape(1).astype(jnp.float32)

    out_flat = pl.pallas_call(
        _sse_kernel,
        out_shape=jax.ShapeDtypeStruct((B, C, HW_pad), x.dtype),
        grid=grid,
        in_specs=[
            pl.BlockSpec((None, C, lane_tile), lambda bi, t: (bi, 0, t)),   # x tile
            pl.BlockSpec((C, 1), lambda bi, t: (0, 0)),                     # weights, resident
            pl.BlockSpec(memory_space=pltpu.MemorySpace.SMEM),              # bias scalar
        ],
        out_specs=pl.BlockSpec((None, C, lane_tile), lambda bi, t: (bi, 0, t)),
        compiler_params=pltpu.CompilerParams(
            dimension_semantics=("parallel", "parallel")),
    )(x_flat, w, b)

    if HW_pad != HW:
        out_flat = out_flat[:, :, :HW]
    return out_flat.reshape(B, C, H, W)


if __name__ == "__main__":
    key = jax.random.PRNGKey(0)
    kx, kw, kb = jax.random.split(key, 3)

    B, C, H, W = 2, 4, 16, 16
    x = jax.random.normal(kx, (B, C, H, W), dtype=jnp.float32)

    # Deterministic synthetic parameters for Conv2d(C, 1, kernel_size=1).
    conv_weight = jax.random.normal(kw, (1, C, 1, 1), dtype=jnp.float32) * 0.1
    conv_bias = jax.random.normal(kb, (1,), dtype=jnp.float32) * 0.1

    y = spatial_se_gate(x, conv_weight, conv_bias)
    y = jax.block_until_ready(y)

    # Pure-JAX reference of the forward (1x1 conv -> sigmoid -> scale).
    squeeze = jax.nn.sigmoid(
        jnp.einsum("bchw,c->bhw", x, conv_weight.reshape(C)) + conv_bias[0]
    )[:, None, :, :]
    ref = squeeze * x
    assert y.shape == (B, C, H, W)
    assert jnp.allclose(y, ref, atol=1e-5, rtol=1e-5), "mismatch vs reference"

    # Exercise the non-multiple-of-128 spatial path (HW=49 -> padded to 128 lanes).
    H2 = W2 = 7
    x2 = jax.random.normal(kx, (B, C, H2, W2), dtype=jnp.float32)
    y2 = jax.block_until_ready(spatial_se_gate(x2, conv_weight, conv_bias))
    squeeze2 = jax.nn.sigmoid(
        jnp.einsum("bchw,c->bhw", x2, conv_weight.reshape(C)) + conv_bias[0]
    )[:, None, :, :]
    assert jnp.allclose(y2, squeeze2 * x2, atol=1e-5, rtol=1e-5), "mismatch (padded path)"

    print("KERNEL_OK")
</pallas_src>

<mosaic_0001>
module attributes {stable_mosaic.version = 11 : i64} {
  func.func @_sse_kernel(%arg0: i32, %arg1: i32, %arg2: memref<1x4x256xf32, #tpu.memory_space<vmem>>, %arg3: memref<4x1xf32, #tpu.memory_space<vmem>>, %arg4: memref<1xf32, #tpu.memory_space<smem>>, %arg5: memref<1x4x256xf32, #tpu.memory_space<vmem>>) attributes {dimension_semantics = [#tpu.dimension_semantics<parallel>, #tpu.dimension_semantics<parallel>], iteration_bounds = array<i64: 2, 1>, scalar_prefetch = 0 : i64, scratch_operands = 0 : i64, tpu.core_type = #tpu.core_type<tc>, window_params = [{transform_indices = @transform_0, window_bounds = array<i64: 1, 4, 256>}, {pipeline_mode = #tpu.pipeline_mode<synchronous>, transform_indices = @transform_1, window_bounds = array<i64: 4, 1>}, {transform_indices = @transform_2, window_bounds = array<i64: 1>}, {transform_indices = @transform_3, window_bounds = array<i64: 1, 4, 256>}]} {
    %c0 = arith.constant 0 : index
    %c0_0 = arith.constant 0 : index
    %c0_1 = arith.constant 0 : index
    %0 = vector.load %arg2[%c0, %c0_0, %c0_1] : memref<1x4x256xf32, #tpu.memory_space<vmem>>, vector<1x4x256xf32>
    %1 = vector.shape_cast %0 : vector<1x4x256xf32> to vector<4x256xf32>
    %c0_2 = arith.constant 0 : index
    %c0_3 = arith.constant 0 : index
    %2 = vector.load %arg3[%c0_2, %c0_3] : memref<4x1xf32, #tpu.memory_space<vmem>>, vector<4x1xf32>
    %3 = vector.broadcast %2 : vector<4x1xf32> to vector<4x256xf32>
    %4 = arith.mulf %1, %3 : vector<4x256xf32>
    %cst = arith.constant dense<0.000000e+00> : vector<256xf32>
    %5 = vector.multi_reduction <add>, %4, %cst [0] : vector<4x256xf32> to vector<256xf32>
    %6 = vector.shape_cast %5 : vector<256xf32> to vector<1x256xf32>
    %c0_4 = arith.constant 0 : index
    %7 = memref.load %arg4[%c0_4] : memref<1xf32, #tpu.memory_space<smem>>
    %8 = vector.broadcast %7 : f32 to vector<1x256xf32>
    %9 = arith.addf %6, %8 : vector<1x256xf32>
    %10 = arith.negf %9 : vector<1x256xf32>
    %11 = math.exp %10 : vector<1x256xf32>
    %cst_5 = arith.constant 1.000000e+00 : f32
    %12 = vector.broadcast %cst_5 : f32 to vector<1x256xf32>
    %13 = arith.addf %12, %11 : vector<1x256xf32>
    %14 = arith.divf %12, %13 : vector<1x256xf32>
    %15 = vector.broadcast %14 : vector<1x256xf32> to vector<4x256xf32>
    %16 = arith.mulf %1, %15 : vector<4x256xf32>
    %c0_6 = arith.constant 0 : index
    %c0_7 = arith.constant 0 : index
    %c0_8 = arith.constant 0 : index
    %17 = vector.load %arg5[%c0_6, %c0_7, %c0_8] : memref<1x4x256xf32, #tpu.memory_space<vmem>>, vector<1x4x256xf32>
    %18 = vector.shape_cast %17 : vector<1x4x256xf32> to vector<4x256xf32>
    %19 = vector.shape_cast %16 : vector<4x256xf32> to vector<1x4x256xf32>
    tpu.vector_store %arg5[%c0_6, %c0_7, %c0_8], %19 {strides = array<i32>} : memref<1x4x256xf32, #tpu.memory_space<vmem>>, vector<1x4x256xf32>,
    return
  }
  func.func @transform_0(%arg0: i32, %arg1: i32) -> (i32, i32, i32) {
    %c0_i32 = arith.constant 0 : i32
    %c0_i32_0 = arith.constant 0 : i32
    return %arg0, %c0_i32, %arg1 : i32, i32, i32
  }
  func.func @transform_1(%arg0: i32, %arg1: i32) -> (i32, i32) {
    %c0_i32 = arith.constant 0 : i32
    %c0_i32_0 = arith.constant 0 : i32
    %c0_i32_1 = arith.constant 0 : i32
    return %c0_i32, %c0_i32_0 : i32, i32
  }
  func.func @transform_2(%arg0: i32, %arg1: i32) -> i32 {
    %c0_i32 = arith.constant 0 : i32
    %c0_i32_0 = arith.constant 0 : i32
    return %c0_i32 : i32
  }
  func.func @transform_3(%arg0: i32, %arg1: i32) -> (i32, i32, i32) {
    %c0_i32 = arith.constant 0 : i32
    %c0_i32_0 = arith.constant 0 : i32
    return %arg0, %c0_i32, %arg1 : i32, i32, i32
  }
}

</mosaic_0001>

<bundles_post_ra>
// kernel: tpu_custom_call.1
= control target key start
LH: loop header
LB: loop body
LE: loop exit
PB: predicated region body
PF: predicated region fallthrough
CT: control target
= control target key end

     0   :  { %s734_s0 = inlined_call_operand.hbm [shape: f32[2,4,256], index: 0, kind: input, shape index: {}]   ;;  %s735_s1 = inlined_call_operand.vmem [shape: f32[4,1], index: 1, kind: input, shape index: {}]   ;;  %s736_s2 = inlined_call_operand.<no memory space> [shape: f32[1], index: 2, kind: input, shape index: {}]   ;;  %s737_s3 = inlined_call_operand.hbm [shape: f32[2,4,256], index: 3, kind: output, shape index: {}]  }
   0x1   :  { %8 = sst [smem:[#allocation2]] %s736_s2 }
   0x2   :  { %9 = vsyncpa [#allocation4], 0 }
   0x3   :  { %11 = vsyncpa [#allocation4 + $0x1], 0 }
   0x4   :  { %12 = vsyncpa [#allocation5], 0 }
   0x5   :  { %14 = vsyncpa [#allocation5 + $0x1], 0  ;;  %s593_s14 = smov 0   ;;  %s595_s15 = smov 0  }
   0x6   :  { %s597_s16 = smov 0   ;;  %s599_s17 = smov 0  }
   0x7   :  { %s601_s18 = smov 0   ;;  %s603_s19 = smov 0  }
   0x8 LB: > { %s364_s2 = sadd.s32 4294967295, %s564_s19   ;;  %s365_s20 = sadd.s32 4294967294, %s564_s19   ;;  %s564_s19 = sphi %s603_s19, %s20_s19   ;;  %s560_s18 = sphi %s601_s18, %s749_s18   ;;  %s556_s17 = sphi %s599_s17, %s748_s17   ;;  %s552_s16 = sphi %s597_s16, %s747_s16   ;;  %s548_s15 = sphi %s595_s15, %s746_s15   ;;  %s544_s14 = sphi %s593_s14, %s745_s14  }
   0x9   : > { %s32_s21 = sadd.s32 1, %s560_s18  ;;  %s41_s22 = sadd.s32 1, %s552_s16 }
   0xa   : > { %p34_p0 = scmp.ge.s32.totalorder %s32_s21, 2  ;;  %p48_p1 = scmp.ne.s32.totalorder %s552_s16, %s548_s15 }
   0xb   : > { %p49_p2 = scmp.eq.s32.totalorder %s564_s19, 0  ;;  %p54_p3 = scmp.ne.s32.totalorder %s548_s15, %s544_s14 }
   0xc   : > { %s751_s21 = smov (%p34_p0, %s32_s21), 0  ;;  %p55_p5 = scmp.eq.s32.totalorder %s364_s2, 0 }
   0xd   : > { %p634_p4 = por %p49_p2, %p48_p1  ;;  %s36_s24 = ssub.s32 %s560_s18, %s751_s21 }
   0xe   : > { %p122_p6 = scmp.eq.s32.totalorder %s364_s2, 1  ;;  %p39_p7 = scmp.eq.s32.totalorder %s36_s24, 0 }
   0xf   : > { %p640_p8 = por %p55_p5, %p54_p3  ;;  %p128_p10 = scmp.eq.s32.totalorder %s365_s20, 1 }
  0x10   : > { %p644_p9 = por %p122_p6, %p48_p1  ;;  %p395_p13 = scmp.lt.s32.totalorder %s564_s19, 2 }
  0x11   : > { %s649_s27 = scalar_select %p39_p7, %s552_s16, %s41_s22  }
  0x12   : > { %p651_p11 = por %p128_p10, %p54_p3  ;;  %s154_s29 = sand.u32 1, %s552_s16  }
  0x13   : > { %s368_s30 = sshll.u32 %s154_s29, 3  ;;  %s381_s4 = sshll.u32 %s560_s18, 7 }
  0x14   : > { %s741_s28 = scalar_select %p651_p11, 1, 0 }
  0x15   : > { %s166_s7 = scalar_lea.hbm %s734_s0, %s381_s4  ;;  %s158_s8 = scalar_lea.vmem [#allocation3], %s368_s30 }
  0x16   : > { %s168_s9 = sshll.u32 %s158_s8, 4  ;;  %p664_p0 = pnand %p395_p13, %p634_p4  ;;  %s169_s9 = int_to_ptr.vmem [resolvable:$true] %s168_s9 }
  0x17   : > { %p371_p1 = scmp.ge.s32.totalorder %s564_s19, 1  ;;  %p173_p2 = scmp.lt.s32.totalorder %s564_s19, 3 }
  0x18   : > { %s155_s11 = scalar_lea.sflag [#allocation4], %s154_s29  ;;  %p458_p3 = pneg %p664_p0 }
  0x19   : > { %s469_s12 = scalar_lea.vmem %s169_s9, 128  ;;  %s566_s13 = smov [#allocation3]  }
  0x1a   : > { %p470_p5 = scmp.ne.s32.totalorder %s169_s9, %s469_s12  ;;  %s474_s2 = sshll.u32 %s566_s13, 4  ;;  %s475_s2 = int_to_ptr.vmem [resolvable:$false] %s474_s2 }
  0x1b   : > { %s476_s20 = scalar_lea.vmem %s475_s2, 256  ;;  %p477_p10 = scmp.lt.s32.totalorder %s169_s9, %s475_s2 }
  0x1c   : > { %p472_p6 = pnand %p470_p5, %p458_p3  ;;  %p478_p12 = scmp.lt.s32.totalorder %s476_s20, %s469_s12 }
  0x1e   : > { %p473_p7 = pneg %p472_p6  ;;  %p479_p4 = por %p478_p12, %p477_p10 }
  0x20   : > { %p480_p13 = pnand %p479_p4, %p473_p7 }
  0x22   : > { %483 = shalt.err (!%p480_p13)
}
  0x23   : > { %390 = dma.hbm_to_vmem [thread:$0]  (!%p664_p0), %s166_s7, 128, %s169_s9, %s155_s11  }
  0x24   : > { %p174_p11 = pnand %p371_p1, %p173_p2 }
  0x25   : > { %s679_s22 = sand.u32 (!%p174_p11), 1, %s548_s15  }
  0x26   : > { %177 = sbr.rel (%p174_p11) target bundleno = 240 (0xf0), region = 32  ;;  %s372_s23 = sshll.u32 (!%p174_p11), %s679_s22, 3 }
  0x27   : > { %s180_s24 = scalar_lea.sflag (!%p174_p11), [#allocation4], %s679_s22  ;;  %s183_s29 = scalar_lea.vmem (!%p174_p11), [#allocation3], %s372_s23 }
  0x2b   : > { %535 = dma.done.wait (%p640_p8), %s180_s24, 128  }
  0x2c   : > { %537 = vsyncadd (%p640_p8), %s180_s24, 4294967168  ;;  %v567_v0 = vmov 0   ;;  %v209_v1 = vld [vmem:[%s735_s1] sm:$0xf]  ;;  %v568_v2 = vmov 839922192   ;;  %v217_v4 = vlaneseq }
  0x2d   : > { %447 = vset.pattern.permute.xlu0 %v567_v0  ;;  %v215_v3 = vunpack.c.l.s4 %v568_v2  ;;  %v208_v9 = vld [vmem:[%s183_s29] sm:$0xff]  ;;  %vm226_vm0 = vcmask 1043456   ;;  %s241_s25 = sld [smem:[#allocation2]]  ;;  %s382_s5 = sshll.u32 %s556_s17, 7 }
  0x2e   : > { %212 = vperm.xlu0 %447, %v209_v1   ;;  %v218_v6 = vshrl.u32 %v217_v4, 7  ;;  %s205_s6 = scalar_lea.vmem [#allocation6], %s372_s23  ;;  %s278_s10 = scalar_lea.hbm %s737_s3, %s382_s5 }
  0x2f   : > { %v216_v5 = vunpack.c.0.s8 %v215_v3  ;;  %s280_s7 = sshll.u32 %s205_s6, 4  ;;  %s264_s11 = scalar_lea.sflag [#allocation5], %s679_s22  ;;  %s281_s7 = int_to_ptr.vmem [resolvable:$true] %s280_s7 }
  0x30   : > { %s484_s12 = scalar_lea.vmem %s281_s7, 128  ;;  %s569_s13 = smov [#allocation6]  }
  0x31   : > { %v219_v7 = vsub.s32 %v216_v5, %v218_v6  ;;  %p485_p8 = scmp.ne.s32.totalorder %s281_s7, %s484_s12  ;;  %s488_s2 = sshll.u32 %s569_s13, 4  ;;  %s489_s2 = int_to_ptr.vmem [resolvable:$false] %s488_s2 }
  0x32   : > { %s490_s17 = scalar_lea.vmem %s489_s2, 256  ;;  %p491_p0 = scmp.lt.s32.totalorder %s281_s7, %s489_s2 }
  0x33   : > { %v242_v24 = vstv %s241_s25  ;;  %p486_p11 = pnand %p485_p8, %p644_p9  ;;  %p492_p1 = scmp.lt.s32.totalorder %s490_s17, %s484_s12 }
  0x35   : > { %p487_p12 = pneg %p486_p11  ;;  %p493_p2 = por %p492_p1, %p491_p0 }
  0x37   : > { %p494_p3 = pnand %p493_p2, %p487_p12 }
  0xa9   : > { %v213_v8 = vpop.permute.xlu0 %212 }
  0xaa   : > { %v220_v10 = vrot.slane %v213_v8, %v219_v7 }
  0xac   : > { %v222_v11 = vmul.f32 %v220_v10, %v208_v9 }
  0xae   : > { %v224_v12 = vcombine.high %v222_v11, %v222_v11  ;;  %v227_v13 = vsel %vm226_vm0, %v222_v11, 0.0 }
  0xaf   : > { %v228_v14 = vrot.slane %v227_v13, 4 }
  0xb0   : > { %v234_v15 = vsel %vm226_vm0, %v224_v12, 0.0 }
  0xb1   : > { %v229_v16 = vadd.f32 %v228_v14, %v227_v13  ;;  %v235_v17 = vrot.slane %v234_v15, 4 }
  0xb3   : > { %v230_v18 = vrot.slane %v229_v16, 2  ;;  %v236_v19 = vadd.f32 %v235_v17, %v234_v15 }
  0xb5   : > { %v231_v20 = vadd.f32 %v230_v18, %v229_v16  ;;  %v237_v21 = vrot.slane %v236_v19, 2 }
  0xb7   : > { %v232_v22 = vrot.slane %v231_v20, 1  ;;  %v238_v23 = vadd.f32 %v237_v21, %v236_v19 }
  0xb9   : > { %v233_v25 = vadd.f32 %v232_v22, %v231_v20  ;;  %v239_v26 = vrot.slane %v238_v23, 1 }
  0xbb   : > { %v240_v27 = vadd.f32 %v239_v26, %v238_v23  ;;  %v243_v28 = vadd.f32 %v242_v24, %v233_v25 }
  0xbd   : > { %v244_v29 = vadd.f32 %v242_v24, %v240_v27  ;;  %v374_v30 = vmul.f32 -1.442695, %v243_v28 }
  0xbf   : > { %448 = vpow2.f32 %v374_v30  ;;  %v375_v31 = vmul.f32 -1.442695, %v244_v29 }
  0xc1   : > { %450 = vpow2.f32 %v375_v31 }
  0xcc   : > { %v449_v32 = vpop.eup %448 }
  0xcd   : > { %v251_v33 = vadd.f32 1.0, %v449_v32 }
  0xce   : > { %v451_v34 = vpop.eup %450 }
  0xcf   : > { %v252_v35 = vadd.f32 1.0, %v451_v34  ;;  %452 = vrcp.f32 %v251_v33 }
  0xd1   : > { %454 = vrcp.f32 %v252_v35 }
  0xdc   : > { %v453_v36 = vpop.eup %452 }
  0xde   : > { %v455_v37 = vpop.eup %454 }
  0xdf   : > { %v259_v38 = vcombine.low %v453_v36, %v455_v37 }
  0xe1   : > { %v261_v39 = vmul.f32 %v259_v38, %v208_v9 }
  0xe3   : > { %262 = vst [vmem:[%s205_s6] sm:$0xff] %v261_v39 }
  0xe4   : > { %497 = shalt.err (!%p494_p3)
}
  0xe5   : > { %s498_s20 = scalar_lea.hbm %s278_s10, 128  ;;  %s502_s24 = scalar_lea.hbm %s737_s3, 256 }
  0xe6   : > { %p499_p5 = scmp.ne.s32.totalorder %s278_s10, %s498_s20  ;;  %p503_p10 = scmp.lt.s32.totalorder %s278_s10, %s737_s3 }
  0xe7   : > { %p504_p4 = scmp.lt.s32.totalorder %s502_s24, %s498_s20 }
  0xe8   : > { %p500_p6 = pnand %p499_p5, %p644_p9 }
  0xe9   : > { %p505_p13 = por %p504_p4, %p503_p10 }
  0xea   : > { %p501_p7 = pneg %p500_p6 }
  0xec   : > { %p506_p8 = pnand %p505_p13, %p501_p7 }
  0xee   : > { %509 = shalt.err (!%p506_p8)
}
  0xef   : > { %385 = dma.vmem_to_hbm [thread:$0]  (%p644_p9), %s281_s7, 128, %s278_s10, %s264_s11  }
  0xf0 PF: > { %s292_s4 = sand.u32 1, %s544_s14   ;;  %p743_p11 = scmp.ne.s32.totalorder %s741_s28, 0 }
  0xf1   : > { %p744_p12 = scmp.ge.s32.totalorder %s564_s19, 2  ;;  %s293_s25 = scalar_lea.sflag [#allocation5], %s292_s4 }
  0xf3   : > { %p392_p0 = pnand %p744_p12, %p743_p11 }
  0xf5   : > { %p393_p1 = pneg %p392_p0 }
  0xf7   : > { %539 = dma.done.wait (%p393_p1), %s293_s25, 128  }
  0xf8   : > { %541 = vsyncadd (%p393_p1), %s293_s25, 4294967168  ;;  %s20_s19 = sadd.s32 1, %s564_s19   ;;  %s745_s14 = smov %s548_s15 }
  0xf9   : > { %p17_p2 = scmp.ge.s32.totalorder %s20_s19, 4   ;;  %s746_s15 = smov %s552_s16 }
  0xfa   : > { %s747_s16 = smov %s649_s27  ;;  %s748_s17 = smov %s560_s18 }
  0xfb   : > { %s749_s18 = smov %s751_s21  ;;  %19 = sbr.rel (!%p17_p2) target bundleno = 8 (0x8), region = 77 }
 0x100   :  { %298 = vsyncpa [#allocation4], 1 }
 0x101   :  { %300 = vsyncpa [#allocation4 + $0x1], 1 }
 0x102   :  { %301 = vsyncpa [#allocation5], 1 }
 0x103   :  { %303 = vsyncpa [#allocation5 + $0x1], 1 }

</bundles_post_ra>
